<compile_context>
chip_gen: v7x
topology: tpu7x:2x2x1
jax: 0.10.0
libtpu: 0.0.40
codegen_flags: <defaults>
</compile_context>

<pallas_src>
import jax
import jax.numpy as jnp
from jax import lax
from jax.experimental import pallas as pl
from jax.experimental.pallas import tpu as pltpu


def med_convblock_kernel(x_ref, w1_ref, w2_ref, w3_ref,
                         b1_ref, b2_ref, b3_ref, o_ref):
    # x_ref:  (1, H, W*Cin)        one image, lane-dense layout
    # w1_ref: (W*Cin,   W*Cmed)    block-diag 1x1 conv (BN1 scale folded in)
    # w2_ref: (3*W*Cmed, W*Cmed)   banded 3x3 conv, stacked over dy=-1,0,+1
    # w3_ref: (W*Cmed,  W*Cin)     block-diag 1x1 conv (BN3 scale folded in)
    # b*_ref: (1, width)           folded BN biases, tiled over W
    H = x_ref.shape[1]
    wc_med = w1_ref.shape[1]            # W * Cmed
    cdt = w1_ref.dtype                  # matmul operand dtype (bf16 or f32)

    x = x_ref[0].astype(jnp.float32)    # (H, W*Cin), f32 kept for the residual

    # ---- conv1 (1x1) + bn1 + relu : one lane-dense matmul ----
    h1 = jnp.dot(x.astype(cdt), w1_ref[...], preferred_element_type=jnp.float32)
    h1 = jnp.maximum(h1 + b1_ref[...], 0.0)                     # (H, W*Cmed)

    # ---- conv2 (3x3, pad=1) : im2col over the 3 row shifts, single matmul ----
    # Height padding is done on the *source* value (no masked sub-tile stores);
    # width padding / dx shifts / channel mixing live in the banded weight.
    zrow = jnp.zeros((1, wc_med), jnp.float32)
    h1p = jnp.concatenate([zrow, h1, zrow], axis=0)             # (H+2, W*Cmed)
    lhs = jnp.concatenate([h1p[0:H],        # dy = -1
                           h1p[1:H + 1],    # dy =  0
                           h1p[2:H + 2]],   # dy = +1
                          axis=1)                               # (H, 3*W*Cmed)
    h2 = jnp.dot(lhs.astype(cdt), w2_ref[...], preferred_element_type=jnp.float32)
    h2 = jnp.maximum(h2 + b2_ref[...], 0.0)                     # (H, W*Cmed)

    # ---- conv3 (1x1) + bn3 + residual + relu ----
    h3 = jnp.dot(h2.astype(cdt), w3_ref[...], preferred_element_type=jnp.float32)
    out = jnp.maximum(h3 + b3_ref[...] + x, 0.0)                # (H, W*Cin)

    o_ref[0] = out.astype(o_ref.dtype)


def med_convblock_pallas(x_nchw, params, *, use_bf16=True):
    """x_nchw: (N, Cin, H, W) float32. Returns same shape/dtype (eval-mode BN)."""
    N, Cin, H, W = x_nchw.shape
    Cmed = Cin // 4
    eps = 1e-6                                       # module uses BatchNorm2d(eps=1e-6)

    # NCHW -> NHWC -> lane-dense (N, H, W*Cin); the reshape is free (contiguous).
    x_flat = jnp.transpose(x_nchw, (0, 2, 3, 1)).reshape(N, H, W * Cin)

    def fold_bn(g, b, m, v):
        s = g / jnp.sqrt(v + eps)
        return s, b - m * s

    s1, b1 = fold_bn(params["bn1_g"], params["bn1_b"], params["bn1_m"], params["bn1_v"])
    s2, b2 = fold_bn(params["bn2_g"], params["bn2_b"], params["bn2_m"], params["bn2_v"])
    s3, b3 = fold_bn(params["bn3_g"], params["bn3_b"], params["bn3_m"], params["bn3_v"])

    # 1x1 convs as channel matmuls, BN scale folded into the output columns.
    w1 = jnp.transpose(params["conv1_w"][:, :, 0, 0], (1, 0)) * s1[None, :]   # (Cin, Cmed)
    w3 = jnp.transpose(params["conv3_w"][:, :, 0, 0], (1, 0)) * s3[None, :]   # (Cmed, Cin)
    # 3x3 taps: w2_t[ky, kx, i, j] = conv2_w[j, i, ky, kx] * s2[j]
    w2_t = jnp.transpose(params["conv2_w"], (2, 3, 1, 0)) * s2[None, None, None, :]

    # "Big" lane-dense weights (trace-time constants; sized for small C*W).
    eye_w = jnp.eye(W, dtype=jnp.float32)
    w1_big = jnp.kron(eye_w, w1)                                 # (W*Cin,  W*Cmed)
    w3_big = jnp.kron(eye_w, w3)                                 # (W*Cmed, W*Cin)
    # Banded dx/channel-mixing matrix per row shift dy, stacked along K.
    w2_blocks = []
    for dy in (-1, 0, 1):
        b_dy = jnp.zeros((W * Cmed, W * Cmed), jnp.float32)
        for dx in (-1, 0, 1):
            shift = jnp.eye(W, W, k=-dx, dtype=jnp.float32)      # [w', w]=1 iff w'=w+dx
            b_dy = b_dy + jnp.kron(shift, w2_t[dy + 1, dx + 1])
        w2_blocks.append(b_dy)
    w2_big = jnp.concatenate(w2_blocks, axis=0)                  # (3*W*Cmed, W*Cmed)

    cdt = jnp.bfloat16 if use_bf16 else jnp.float32
    w1_big = w1_big.astype(cdt)
    w2_big = w2_big.astype(cdt)
    w3_big = w3_big.astype(cdt)

    b1_big = jnp.tile(b1, W)[None, :]                            # (1, W*Cmed)
    b2_big = jnp.tile(b2, W)[None, :]                            # (1, W*Cmed)
    b3_big = jnp.tile(b3, W)[None, :]                            # (1, W*Cin)

    WCin, WCmed = W * Cin, W * Cmed
    full2 = lambda r, c: pl.BlockSpec((r, c), lambda n: (0, 0))

    out_flat = pl.pallas_call(
        med_convblock_kernel,
        out_shape=jax.ShapeDtypeStruct((N, H, WCin), x_flat.dtype),
        grid_spec=pltpu.PrefetchScalarGridSpec(
            num_scalar_prefetch=0,
            grid=(N,),
            in_specs=[
                pl.BlockSpec((1, H, WCin), lambda n: (n, 0, 0)),
                full2(WCin, WCmed),
                full2(3 * WCmed, WCmed),
                full2(WCmed, WCin),
                full2(1, WCmed), full2(1, WCmed), full2(1, WCin),
            ],
            out_specs=pl.BlockSpec((1, H, WCin), lambda n: (n, 0, 0)),
        ),
        compiler_params=pltpu.CompilerParams(
            dimension_semantics=("parallel",)),
    )(x_flat, w1_big, w2_big, w3_big, b1_big, b2_big, b3_big)

    return jnp.transpose(out_flat.reshape(N, H, W, Cin), (0, 3, 1, 2))   # back to NCHW


def med_convblock_ref(x_nchw, params):
    """Pure-JAX reference (NCHW, matches PyTorch eval-mode forward)."""
    eps = 1e-6
    dn = ("NCHW", "OIHW", "NCHW")

    def bn(x, g, b, m, v):
        g = g.reshape(1, -1, 1, 1); b = b.reshape(1, -1, 1, 1)
        m = m.reshape(1, -1, 1, 1); v = v.reshape(1, -1, 1, 1)
        return (x - m) / jnp.sqrt(v + eps) * g + b

    residual = x_nchw
    x = lax.conv_general_dilated(x_nchw, params["conv1_w"], (1, 1), "VALID",
                                 dimension_numbers=dn)
    x = jax.nn.relu(bn(x, params["bn1_g"], params["bn1_b"], params["bn1_m"], params["bn1_v"]))
    x = lax.conv_general_dilated(x, params["conv2_w"], (1, 1), ((1, 1), (1, 1)),
                                 dimension_numbers=dn)
    x = jax.nn.relu(bn(x, params["bn2_g"], params["bn2_b"], params["bn2_m"], params["bn2_v"]))
    x = lax.conv_general_dilated(x, params["conv3_w"], (1, 1), "VALID",
                                 dimension_numbers=dn)
    x = bn(x, params["bn3_g"], params["bn3_b"], params["bn3_m"], params["bn3_v"])
    return jax.nn.relu(x + residual)


def make_params(key, inplanes):
    med = inplanes // 4
    ks = jax.random.split(key, 12)
    return {
        "conv1_w": jax.random.normal(ks[0], (med, inplanes, 1, 1), jnp.float32) * 0.1,
        "conv2_w": jax.random.normal(ks[1], (med, med, 3, 3), jnp.float32) * 0.1,
        "conv3_w": jax.random.normal(ks[2], (inplanes, med, 1, 1), jnp.float32) * 0.1,
        "bn1_g": jax.random.uniform(ks[3], (med,), jnp.float32, 0.5, 1.5),
        "bn1_b": jax.random.normal(ks[4], (med,), jnp.float32) * 0.1,
        "bn1_m": jax.random.normal(ks[5], (med,), jnp.float32) * 0.1,
        "bn1_v": jax.random.uniform(ks[6], (med,), jnp.float32, 0.5, 1.5),
        "bn2_g": jax.random.uniform(ks[7], (med,), jnp.float32, 0.5, 1.5),
        "bn2_b": jax.random.normal(ks[8], (med,), jnp.float32) * 0.1,
        "bn2_m": jax.random.normal(ks[9], (med,), jnp.float32) * 0.1,
        "bn2_v": jax.random.uniform(ks[10], (med,), jnp.float32, 0.5, 1.5),
        "bn3_g": jax.random.uniform(ks[11], (inplanes,), jnp.float32, 0.5, 1.5),
        "bn3_b": jnp.linspace(-0.1, 0.1, inplanes, dtype=jnp.float32),
        "bn3_m": jnp.linspace(-0.05, 0.05, inplanes, dtype=jnp.float32),
        "bn3_v": jnp.linspace(0.8, 1.2, inplanes, dtype=jnp.float32),
    }


if __name__ == "__main__":
    N, Cin, H, W = 2, 16, 16, 16          # inplanes=16 -> med_planes=4
    key = jax.random.PRNGKey(0)
    kx, kp = jax.random.split(key)
    x = jax.random.normal(kx, (N, Cin, H, W), jnp.float32)
    params = make_params(kp, Cin)

    ref = jax.block_until_ready(med_convblock_ref(x, params))

    # Structure check: f32 matmul path must match the reference tightly.
    out_f32 = jax.block_until_ready(med_convblock_pallas(x, params, use_bf16=False))
    err_f32 = float(jnp.max(jnp.abs(out_f32 - ref)))
    assert err_f32 < 1e-4, f"f32 kernel mismatch vs reference: {err_f32}"

    # Shipped fast path: bf16 MXU operands, f32 accumulation / elementwise.
    out = jax.block_until_ready(med_convblock_pallas(x, params, use_bf16=True))
    assert out.shape == x.shape and out.dtype == x.dtype
    err_bf16 = float(jnp.max(jnp.abs(out - ref)))
    assert err_bf16 < 3e-2, f"bf16 kernel mismatch vs reference: {err_bf16}"

    print("KERNEL_OK")
</pallas_src>

<mosaic_0001>
module attributes {stable_mosaic.version = 11 : i64} {
  func.func @med_convblock_kernel(%arg0: i32, %arg1: memref<1x16x256xf32, #tpu.memory_space<vmem>>, %arg2: memref<256x64xf32, #tpu.memory_space<vmem>>, %arg3: memref<192x64xf32, #tpu.memory_space<vmem>>, %arg4: memref<64x256xf32, #tpu.memory_space<vmem>>, %arg5: memref<1x64xf32, #tpu.memory_space<vmem>>, %arg6: memref<1x64xf32, #tpu.memory_space<vmem>>, %arg7: memref<1x256xf32, #tpu.memory_space<vmem>>, %arg8: memref<1x16x256xf32, #tpu.memory_space<vmem>>) attributes {dimension_semantics = [#tpu.dimension_semantics<parallel>], iteration_bounds = array<i64: 2>, scalar_prefetch = 0 : i64, scratch_operands = 0 : i64, tpu.core_type = #tpu.core_type<tc>, window_params = [{transform_indices = @transform_0, window_bounds = array<i64: 1, 16, 256>}, {pipeline_mode = #tpu.pipeline_mode<synchronous>, transform_indices = @transform_1, window_bounds = array<i64: 256, 64>}, {pipeline_mode = #tpu.pipeline_mode<synchronous>, transform_indices = @transform_2, window_bounds = array<i64: 192, 64>}, {pipeline_mode = #tpu.pipeline_mode<synchronous>, transform_indices = @transform_3, window_bounds = array<i64: 64, 256>}, {pipeline_mode = #tpu.pipeline_mode<synchronous>, transform_indices = @transform_4, window_bounds = array<i64: 1, 64>}, {pipeline_mode = #tpu.pipeline_mode<synchronous>, transform_indices = @transform_5, window_bounds = array<i64: 1, 64>}, {pipeline_mode = #tpu.pipeline_mode<synchronous>, transform_indices = @transform_6, window_bounds = array<i64: 1, 256>}, {transform_indices = @transform_7, window_bounds = array<i64: 1, 16, 256>}]} {
    %c0 = arith.constant 0 : index
    %c0_0 = arith.constant 0 : index
    %c0_1 = arith.constant 0 : index
    %0 = vector.load %arg1[%c0, %c0_0, %c0_1] : memref<1x16x256xf32, #tpu.memory_space<vmem>>, vector<1x16x256xf32>
    %1 = vector.shape_cast %0 : vector<1x16x256xf32> to vector<16x256xf32>
    %c0_2 = arith.constant 0 : index
    %c0_3 = arith.constant 0 : index
    %2 = vector.load %arg2[%c0_2, %c0_3] : memref<256x64xf32, #tpu.memory_space<vmem>>, vector<256x64xf32>
    %cst = arith.constant dense<0.000000e+00> : vector<16x64xf32>
    %3 = tpu.matmul %1, %2, %cst {dimension_numbers = #tpu.dot_dimension_numbers<[1], [0], [0], [1], [0, 0, 1, 1], [], []>} : vector<16x256xf32>, vector<256x64xf32>, vector<16x64xf32> -> vector<16x64xf32>
    %c0_4 = arith.constant 0 : index
    %c0_5 = arith.constant 0 : index
    %4 = vector.load %arg5[%c0_4, %c0_5] : memref<1x64xf32, #tpu.memory_space<vmem>>, vector<1x64xf32>
    %5 = vector.broadcast %4 : vector<1x64xf32> to vector<16x64xf32>
    %6 = arith.addf %3, %5 : vector<16x64xf32>
    %cst_6 = arith.constant 0.000000e+00 : f32
    %7 = vector.broadcast %cst_6 : f32 to vector<16x64xf32>
    %8 = arith.maximumf %6, %7 : vector<16x64xf32>
    %cst_7 = arith.constant 0.000000e+00 : f32
    %9 = vector.broadcast %cst_7 : f32 to vector<1x64xf32>
    %10 = tpu.concatenate %9, %8, %9 in 0 : vector<1x64xf32>, vector<16x64xf32>, vector<1x64xf32> -> vector<18x64xf32>
    %11 = vector.extract_strided_slice %10 {offsets = [0, 0], sizes = [16, 64], strides = [1, 1]} : vector<18x64xf32> to vector<16x64xf32>
    %12 = vector.extract_strided_slice %10 {offsets = [1, 0], sizes = [16, 64], strides = [1, 1]} : vector<18x64xf32> to vector<16x64xf32>
    %13 = vector.extract_strided_slice %10 {offsets = [2, 0], sizes = [16, 64], strides = [1, 1]} : vector<18x64xf32> to vector<16x64xf32>
    %14 = tpu.concatenate %11, %12, %13 in 1 : vector<16x64xf32>, vector<16x64xf32>, vector<16x64xf32> -> vector<16x192xf32>
    %c0_8 = arith.constant 0 : index
    %c0_9 = arith.constant 0 : index
    %15 = vector.load %arg3[%c0_8, %c0_9] : memref<192x64xf32, #tpu.memory_space<vmem>>, vector<192x64xf32>
    %cst_10 = arith.constant dense<0.000000e+00> : vector<16x64xf32>
    %16 = tpu.matmul %14, %15, %cst_10 {dimension_numbers = #tpu.dot_dimension_numbers<[1], [0], [0], [1], [0, 0, 1, 1], [], []>} : vector<16x192xf32>, vector<192x64xf32>, vector<16x64xf32> -> vector<16x64xf32>
    %c0_11 = arith.constant 0 : index
    %c0_12 = arith.constant 0 : index
    %17 = vector.load %arg6[%c0_11, %c0_12] : memref<1x64xf32, #tpu.memory_space<vmem>>, vector<1x64xf32>
    %18 = vector.broadcast %17 : vector<1x64xf32> to vector<16x64xf32>
    %19 = arith.addf %16, %18 : vector<16x64xf32>
    %cst_13 = arith.constant 0.000000e+00 : f32
    %20 = vector.broadcast %cst_13 : f32 to vector<16x64xf32>
    %21 = arith.maximumf %19, %20 : vector<16x64xf32>
    %c0_14 = arith.constant 0 : index
    %c0_15 = arith.constant 0 : index
    %22 = vector.load %arg4[%c0_14, %c0_15] : memref<64x256xf32, #tpu.memory_space<vmem>>, vector<64x256xf32>
    %cst_16 = arith.constant dense<0.000000e+00> : vector<16x256xf32>
    %23 = tpu.matmul %21, %22, %cst_16 {dimension_numbers = #tpu.dot_dimension_numbers<[1], [0], [0], [1], [0, 0, 1, 1], [], []>} : vector<16x64xf32>, vector<64x256xf32>, vector<16x256xf32> -> vector<16x256xf32>
    %c0_17 = arith.constant 0 : index
    %c0_18 = arith.constant 0 : index
    %24 = vector.load %arg7[%c0_17, %c0_18] : memref<1x256xf32, #tpu.memory_space<vmem>>, vector<1x256xf32>
    %25 = vector.broadcast %24 : vector<1x256xf32> to vector<16x256xf32>
    %26 = arith.addf %23, %25 : vector<16x256xf32>
    %27 = arith.addf %26, %1 : vector<16x256xf32>
    %cst_19 = arith.constant 0.000000e+00 : f32
    %28 = vector.broadcast %cst_19 : f32 to vector<16x256xf32>
    %29 = arith.maximumf %27, %28 : vector<16x256xf32>
    %c0_20 = arith.constant 0 : index
    %c0_21 = arith.constant 0 : index
    %c0_22 = arith.constant 0 : index
    %30 = vector.load %arg8[%c0_20, %c0_21, %c0_22] : memref<1x16x256xf32, #tpu.memory_space<vmem>>, vector<1x16x256xf32>
    %31 = vector.shape_cast %30 : vector<1x16x256xf32> to vector<16x256xf32>
    %32 = vector.shape_cast %29 : vector<16x256xf32> to vector<1x16x256xf32>
    tpu.vector_store %arg8[%c0_20, %c0_21, %c0_22], %32 {strides = array<i32>} : memref<1x16x256xf32, #tpu.memory_space<vmem>>, vector<1x16x256xf32>,
    return
  }
  func.func @transform_0(%arg0: i32) -> (i32, i32, i32) {
    %c0_i32 = arith.constant 0 : i32
    %c0_i32_0 = arith.constant 0 : i32
    %c0_i32_1 = arith.constant 0 : i32
    return %arg0, %c0_i32, %c0_i32_0 : i32, i32, i32
  }
  func.func @transform_1(%arg0: i32) -> (i32, i32) {
    %c0_i32 = arith.constant 0 : i32
    %c0_i32_0 = arith.constant 0 : i32
    %c0_i32_1 = arith.constant 0 : i32
    return %c0_i32, %c0_i32_0 : i32, i32
  }
  func.func @transform_2(%arg0: i32) -> (i32, i32) {
    %c0_i32 = arith.constant 0 : i32
    %c0_i32_0 = arith.constant 0 : i32
    %c0_i32_1 = arith.constant 0 : i32
    return %c0_i32, %c0_i32_0 : i32, i32
  }
  func.func @transform_3(%arg0: i32) -> (i32, i32) {
    %c0_i32 = arith.constant 0 : i32
    %c0_i32_0 = arith.constant 0 : i32
    %c0_i32_1 = arith.constant 0 : i32
    return %c0_i32, %c0_i32_0 : i32, i32
  }
  func.func @transform_4(%arg0: i32) -> (i32, i32) {
    %c0_i32 = arith.constant 0 : i32
    %c0_i32_0 = arith.constant 0 : i32
    %c0_i32_1 = arith.constant 0 : i32
    return %c0_i32, %c0_i32_0 : i32, i32
  }
  func.func @transform_5(%arg0: i32) -> (i32, i32) {
    %c0_i32 = arith.constant 0 : i32
    %c0_i32_0 = arith.constant 0 : i32
    %c0_i32_1 = arith.constant 0 : i32
    return %c0_i32, %c0_i32_0 : i32, i32
  }
  func.func @transform_6(%arg0: i32) -> (i32, i32) {
    %c0_i32 = arith.constant 0 : i32
    %c0_i32_0 = arith.constant 0 : i32
    %c0_i32_1 = arith.constant 0 : i32
    return %c0_i32, %c0_i32_0 : i32, i32
  }
  func.func @transform_7(%arg0: i32) -> (i32, i32, i32) {
    %c0_i32 = arith.constant 0 : i32
    %c0_i32_0 = arith.constant 0 : i32
    %c0_i32_1 = arith.constant 0 : i32
    return %arg0, %c0_i32, %c0_i32_0 : i32, i32, i32
  }
}

</mosaic_0001>

<bundles_post_ra>
// kernel: tpu_custom_call.1
= control target key start
LH: loop header
LB: loop body
LE: loop exit
PB: predicated region body
PF: predicated region fallthrough
CT: control target
= control target key end

     0   :  { %12 = vsyncpa [#allocation3], 0  ;;  %s1401_s0 = inlined_call_operand.vmem [shape: f32[2,16,256], index: 0, kind: input, shape index: {}]   ;;  %s1402_s1 = inlined_call_operand.vmem [shape: f32[256,64], index: 1, kind: input, shape index: {}]   ;;  %s1403_s2 = inlined_call_operand.vmem [shape: f32[192,64], index: 2, kind: input, shape index: {}]   ;;  %s1404_s3 = inlined_call_operand.vmem [shape: f32[64,256], index: 3, kind: input, shape index: {}]   ;;  %s1405_s4 = inlined_call_operand.vmem [shape: f32[1,64], index: 4, kind: input, shape index: {}]   ;;  %s1406_s5 = inlined_call_operand.vmem [shape: f32[1,64], index: 5, kind: input, shape index: {}]   ;;  %s1407_s6 = inlined_call_operand.vmem [shape: f32[1,256], index: 6, kind: input, shape index: {}]   ;;  %s1408_s7 = inlined_call_operand.hbm [shape: f32[2,16,256], index: 7, kind: output, shape index: {}]  }
   0x1   :  { %14 = vsyncpa [#allocation3 + $0x1], 0  ;;  %s1038_s24 = smov 0   ;;  %s1040_s25 = smov 0  }
   0x2   :  { %s1042_s26 = smov 0   ;;  %s1044_s27 = smov 0  }
   0x3 LB: > { %s1059_s28 = sadd.s32 4294967295, %s990_s27   ;;  %s742_s29 = sadd.s32 4294967294, %s990_s27   ;;  %s990_s27 = sphi %s1044_s27, %s1414_s27   ;;  %s986_s26 = sphi %s1042_s26, %s1413_s26   ;;  %s982_s25 = sphi %s1040_s25, %s1412_s25   ;;  %s978_s24 = sphi %s1038_s24, %s1411_s24  }
   0x4   : > { %s1063_s30 = sadd.s32 1, %s990_s27   ;;  %s179_s8 = sadd.s32 1, %s986_s26 }
   0x5   : > { %s176_s9 = ssub.s32 %s990_s27, %s1063_s30  ;;  %p189_p0 = scmp.ne.s32.totalorder %s986_s26, %s982_s25 }
   0x6   : > { %p177_p1 = scmp.eq.s32.totalorder %s176_s9, 0  ;;  %p190_p2 = scmp.eq.s32.totalorder %s1059_s28, 1 }
   0x7   : > { %p195_p3 = scmp.ne.s32.totalorder %s982_s25, %s978_s24  ;;  %p196_p4 = scmp.eq.s32.totalorder %s742_s29, 1 }
   0x8   : > { %s1074_s10 = scalar_select %p177_p1, %s986_s26, %s179_s8  }
   0x9   : > { %p1076_p5 = por %p190_p2, %p189_p0  ;;  %p1080_p6 = por %p196_p4, %p195_p3 }
   0xa   : > { %p745_p7 = scmp.ge.s32.totalorder %s990_s27, 1  ;;  %p240_p8 = scmp.lt.s32.totalorder %s990_s27, 3 }
   0xc   : > { %p241_p9 = pnand %p745_p7, %p240_p8 }
   0xd   : > { %v297_v0 = vld [vmem:[%s1402_s1 + $0x80] sm:$0xff] (!%p241_p9)  ;;  %v298_v1 = vld [vmem:[%s1402_s1 + $0x88] sm:$0xff] (!%p241_p9)  ;;  %p272_p10 = scmp.lt.s32.totalorder (!%p241_p9), %s1059_s28, 1  ;;  %v299_v5 = vld [vmem:[%s1402_s1 + $0x90] sm:$0xff] (!%p241_p9)  ;;  %v992_v55 = vmov (!%p241_p9), 0.0|0.0   ;;  %vm399_vm0 = vcmask (!%p241_p9), 1040384  }
   0xe   : > { %244 = sbr.rel (%p241_p9) target bundleno = 847 (0x34f), region = 48  ;;  %v281_v2 = vld [vmem:[%s1402_s1] sm:$0xff] (!%p241_p9)  ;;  %v800_v3 = vpack.c.bf16 (!%p241_p9), %v298_v1, %v297_v0  ;;  %v282_v4 = vld [vmem:[%s1402_s1 + $0x8] sm:$0xff] (!%p241_p9)  ;;  %v300_v6 = vld [vmem:[%s1402_s1 + $0x98] sm:$0xff] (!%p241_p9)  ;;  %832 = vmatprep.subr.bf16.mxu1 (!%p241_p9), %v992_v55  ;;  %vm422_vm1 = vcmask (!%p241_p9), 1045504   ;;  %vm428_vm2 = vcmask (!%p241_p9), 523264  }
   0xf   : > { %v802_v7 = vpack.c.bf16 (!%p241_p9), %v282_v4, %v281_v2  ;;  %v804_v8 = vpack.c.bf16 (!%p241_p9), %v300_v6, %v299_v5  ;;  %v283_v9 = vld [vmem:[%s1402_s1 + $0x10] sm:$0xff] (!%p241_p9)  ;;  %v284_v10 = vld [vmem:[%s1402_s1 + $0x18] sm:$0xff] (!%p241_p9)  ;;  %v301_v11 = vld [vmem:[%s1402_s1 + $0xa0] sm:$0xff] (!%p241_p9)  ;;  %vm410_vm3 = vcmask (!%p241_p9), 1046528   ;;  %s993_s19 = smov (!%p241_p9), 64   ;;  %s269_s18 = sand.u32 (!%p241_p9), 1, %s982_s25  }
  0x10   : > { %801 = vmatprep.subr.bf16.mxu0 (!%p241_p9), %v800_v3  ;;  %v302_v12 = vld [vmem:[%s1402_s1 + $0xa8] sm:$0xff] (!%p241_p9)  ;;  %v806_v13 = vpack.c.bf16 (!%p241_p9), %v284_v10, %v283_v9  ;;  %v285_v15 = vld [vmem:[%s1402_s1 + $0x20] sm:$0xff] (!%p241_p9)  ;;  %v303_v17 = vld [vmem:[%s1402_s1 + $0xb0] sm:$0xff] (!%p241_p9)  ;;  %s995_s9 = smov (!%p241_p9), [#allocation2]  }
  0x11   : > { %803 = vmatpush3.bf16.msra.mxu0 (!%p241_p9), %v802_v7  ;;  %v808_v14 = vpack.c.bf16 (!%p241_p9), %v302_v12, %v301_v11  ;;  %v286_v16 = vld [vmem:[%s1402_s1 + $0x28] sm:$0xff] (!%p241_p9)  ;;  %v304_v18 = vld [vmem:[%s1402_s1 + $0xb8] sm:$0xff] (!%p241_p9)  ;;  %v287_v21 = vld [vmem:[%s1402_s1 + $0x30] sm:$0xff] (!%p241_p9)  ;;  %s932_s13 = sshll.u32 (!%p241_p9), %s995_s9, 4  ;;  %s933_s13 = int_to_ptr.vmem [resolvable:$false] %s932_s13 }
  0x12   : > { %805 = vmatprep.subr.bf16.mxu0 (!%p241_p9), %v804_v8  ;;  %v810_v19 = vpack.c.bf16 (!%p241_p9), %v286_v16, %v285_v15  ;;  %v812_v20 = vpack.c.bf16 (!%p241_p9), %v304_v18, %v303_v17  ;;  %v288_v22 = vld [vmem:[%s1402_s1 + $0x38] sm:$0xff] (!%p241_p9)  ;;  %v305_v23 = vld [vmem:[%s1402_s1 + $0xc0] sm:$0xff] (!%p241_p9)  ;;  %v306_v24 = vld [vmem:[%s1402_s1 + $0xc8] sm:$0xff] (!%p241_p9)  ;;  %s934_s14 = scalar_lea.vmem (!%p241_p9), %s933_s13, 1024 }
  0x13   : > { %v814_v26 = vpack.c.bf16 (!%p241_p9), %v288_v22, %v287_v21  ;;  %v816_v27 = vpack.c.bf16 (!%p241_p9), %v306_v24, %v305_v23  ;;  %v289_v28 = vld [vmem:[%s1402_s1 + $0x40] sm:$0xff] (!%p241_p9)  ;;  %v290_v29 = vld [vmem:[%s1402_s1 + $0x48] sm:$0xff] (!%p241_p9)  ;;  %v307_v30 = vld [vmem:[%s1402_s1 + $0xd0] sm:$0xff] (!%p241_p9) }
  0x14   : > { %v308_v31 = vld [vmem:[%s1402_s1 + $0xd8] sm:$0xff] (!%p241_p9)  ;;  %v818_v32 = vpack.c.bf16 (!%p241_p9), %v290_v29, %v289_v28  ;;  %v291_v34 = vld [vmem:[%s1402_s1 + $0x50] sm:$0xff] (!%p241_p9)  ;;  %v309_v36 = vld [vmem:[%s1402_s1 + $0xe0] sm:$0xff] (!%p241_p9) }
  0x15   : > { %s273_s17 = scalar_select %p272_p10, %s1059_s28, 1  ;;  %807 = vmatpush3.bf16.msra.mxu0 %v806_v13  ;;  %v820_v33 = vpack.c.bf16 %v308_v31, %v307_v30  ;;  %v292_v35 = vld [vmem:[%s1402_s1 + $0x58] sm:$0xff]  ;;  %v310_v37 = vld [vmem:[%s1402_s1 + $0xe8] sm:$0xff]  ;;  %v293_v40 = vld [vmem:[%s1402_s1 + $0x60] sm:$0xff] }
  0x16   : > { %809 = vmatprep.subr.bf16.mxu0 %v808_v14  ;;  %v822_v38 = vpack.c.bf16 %v292_v35, %v291_v34  ;;  %v824_v39 = vpack.c.bf16 %v310_v37, %v309_v36  ;;  %v294_v41 = vld [vmem:[%s1402_s1 + $0x68] sm:$0xff]  ;;  %v311_v42 = vld [vmem:[%s1402_s1 + $0xf0] sm:$0xff]  ;;  %v312_v43 = vld [vmem:[%s1402_s1 + $0xf8] sm:$0xff] }
  0x17   : > { %s760_s20 = sshll.u32 %s273_s17, 5  ;;  %v826_v44 = vpack.c.bf16 %v294_v41, %v293_v40  ;;  %v828_v45 = vpack.c.bf16 %v312_v43, %v311_v42  ;;  %v295_v46 = vld [vmem:[%s1402_s1 + $0x70] sm:$0xff]  ;;  %v296_v47 = vld [vmem:[%s1402_s1 + $0x78] sm:$0xff]  ;;  %v431_v52 = vld [vmem:[%s1403_s2] sm:$0xff] }
  0x18   : > { %s1133_s17 = scalar_lea.vmem %s1401_s0, %s760_s20  ;;  %v830_v48 = vpack.c.bf16 %v296_v47, %v295_v46  ;;  %v432_v53 = vld [vmem:[%s1403_s2 + $0x8] sm:$0xff]  ;;  %v433_v54 = vld [vmem:[%s1403_s2 + $0x10] sm:$0xff]  ;;  %v434_v57 = vld [vmem:[%s1403_s2 + $0x18] sm:$0xff] }
  0x19   : > { %v1148_v25 = vld [vmem:[%s1133_s17 + $0x8] sm:$0xff]  ;;  %811 = vmatpush3.bf16.msra.mxu0 %v810_v19  ;;  %v1194_v49 = vld [vmem:[%s1133_s17] sm:$0xff]  ;;  %v1197_v50 = vld [vmem:[%s1133_s17 + $0x18] sm:$0xff]  ;;  %v833_v56 = vpack.c.bf16 %v432_v53, %v431_v52  ;;  %v836_v58 = vpack.c.bf16 %v434_v57, %v433_v54 }
  0x1a   : > { %384 = vmatprep.mubr.f32.mxu0 %v1148_v25  ;;  %813 = vmatprep.subr.bf16.mxu0 %v812_v20  ;;  %v1202_v51 = vld [vmem:[%s1133_s17 + $0x10] sm:$0xff]  ;;  %v435_v59 = vld [vmem:[%s1403_s2 + $0x20] sm:$0xff]  ;;  %v436_v60 = vld [vmem:[%s1403_s2 + $0x28] sm:$0xff]  ;;  %s761_s17 = sshll.u32 %s1059_s28, 9  ;;  %s1360_s28 = scalar_lea.sflag [#allocation3], %s269_s18 }
  0x1b   : > { %834 = vmatpush1.bf16.msra.mxu1 %v833_v56  ;;  %v839_v61 = vpack.c.bf16 %v436_v60, %v435_v59  ;;  %v437_v62 = vld [vmem:[%s1403_s2 + $0x30] sm:$0xff]  ;;  %v438_v63 = vld [vmem:[%s1403_s2 + $0x38] sm:$0xff]  ;;  %v439_v1 = vld [vmem:[%s1403_s2 + $0x40] sm:$0xff]  ;;  %s1358_s8 = scalar_lea.hbm %s1408_s7, %s761_s17 }
  0x1c   : > { %835 = vmatprep.subr.bf16.mxu1 %v992_v55  ;;  %v842_v0 = vpack.c.bf16 %v438_v63, %v437_v62  ;;  %v440_v2 = vld [vmem:[%s1403_s2 + $0x48] sm:$0xff]  ;;  %v441_v4 = vld [vmem:[%s1403_s2 + $0x50] sm:$0xff]  ;;  %v442_v5 = vld [vmem:[%s1403_s2 + $0x58] sm:$0xff] }
  0x1d   : > { %815 = vmatpush3.bf16.msra.mxu0 %v814_v26  ;;  %v845_v3 = vpack.c.bf16 %v440_v2, %v439_v1  ;;  %v848_v6 = vpack.c.bf16 %v442_v5, %v441_v4  ;;  %v443_v7 = vld [vmem:[%s1403_s2 + $0x60] sm:$0xff]  ;;  %v444_v8 = vld [vmem:[%s1403_s2 + $0x68] sm:$0xff]  ;;  %v445_v10 = vld [vmem:[%s1403_s2 + $0x70] sm:$0xff] }
  0x1e   : > { %817 = vmatprep.subr.bf16.mxu0 %v816_v27  ;;  %v851_v9 = vpack.c.bf16 %v444_v8, %v443_v7  ;;  %v446_v11 = vld [vmem:[%s1403_s2 + $0x78] sm:$0xff]  ;;  %v447_v13 = vld [vmem:[%s1403_s2 + $0x80] sm:$0xff]  ;;  %v448_v14 = vld [vmem:[%s1403_s2 + $0x88] sm:$0xff] }
  0x1f   : > { %837 = vmatpush1.bf16.msra.mxu1 %v836_v58  ;;  %v854_v12 = vpack.c.bf16 %v446_v11, %v445_v10  ;;  %v857_v15 = vpack.c.bf16 %v448_v14, %v447_v13  ;;  %v449_v16 = vld [vmem:[%s1403_s2 + $0x90] sm:$0xff]  ;;  %v450_v17 = vld [vmem:[%s1403_s2 + $0x98] sm:$0xff]  ;;  %v451_v19 = vld [vmem:[%s1403_s2 + $0xa0] sm:$0xff] }
  0x20   : > { %838 = vmatprep.subr.bf16.mxu1 %v992_v55  ;;  %v860_v18 = vpack.c.bf16 %v450_v17, %v449_v16  ;;  %v452_v20 = vld [vmem:[%s1403_s2 + $0xa8] sm:$0xff]  ;;  %v453_v22 = vld [vmem:[%s1403_s2 + $0xb0] sm:$0xff]  ;;  %v454_v23 = vld [vmem:[%s1403_s2 + $0xb8] sm:$0xff] }
  0x21   : > { %819 = vmatpush3.bf16.msra.mxu0 %v818_v32  ;;  %v863_v21 = vpack.c.bf16 %v452_v20, %v451_v19  ;;  %v866_v24 = vpack.c.bf16 %v454_v23, %v453_v22  ;;  %v749_v27 = vld [vmem:[%s1405_s4] ss:$0 sm:$0xff]  ;;  %v545_v43 = vld [vmem:[%s1404_s3 + $0x10] sm:$0xff]  ;;  %v552_v54 = vld [vmem:[%s1404_s3 + $0x48] sm:$0xff]  ;;  %v994_v19 = vmov 0.0  }
  0x22   : > { %821 = vmatprep.subr.bf16.mxu0 %v820_v33  ;;  %v543_v40 = vld [vmem:[%s1404_s3] sm:$0xff]  ;;  %v549_v53 = vld [vmem:[%s1404_s3 + $0x30] sm:$0xff]  ;;  %v556_v13 = vld [vmem:[%s1404_s3 + $0x68] sm:$0xff] }
  0x23   : > { %840 = vmatpush1.bf16.msra.mxu1 %v839_v61  ;;  %v870_v47 = vpack.c.bf16 %v545_v43, %v543_v40  ;;  %v547_v52 = vld [vmem:[%s1404_s3 + $0x20] sm:$0xff]  ;;  %v553_v2 = vld [vmem:[%s1404_s3 + $0x50] sm:$0xff]  ;;  %v558_v14 = vld [vmem:[%s1404_s3 + $0x78] sm:$0xff] }
  0x24   : > { %841 = vmatprep.subr.bf16.mxu1 %v992_v55  ;;  %v874_v63 = vpack.c.bf16 %v549_v53, %v547_v52  ;;  %v551_v1 = vld [vmem:[%s1404_s3 + $0x40] sm:$0xff]  ;;  %v557_v17 = vld [vmem:[%s1404_s3 + $0x70] sm:$0xff] }
  0x25   : > { %823 = vmatpush3.bf16.msra.mxu0 %v822_v38  ;;  %v544_v38 = vld [vmem:[%s1404_s3 + $0x8] sm:$0xff]  ;;  %v878_v7 = vpack.c.bf16 %v553_v2, %v551_v1  ;;  %v555_v16 = vld [vmem:[%s1404_s3 + $0x60] sm:$0xff] }
  0x26   : > { %825 = vmatprep.subr.bf16.mxu0 %v824_v39  ;;  %v546_v39 = vld [vmem:[%s1404_s3 + $0x18] sm:$0xff]  ;;  %v750_v20 = vld [vmem:[%s1406_s5] ss:$0 sm:$0xff] }
  0x27   : > { %843 = vmatpush1.bf16.msra.mxu1 %v842_v0  ;;  %v868_v42 = vpack.c.bf16 %v546_v39, %v544_v38 }
  0x28   : > { %844 = vmatprep.subr.bf16.mxu1 %v992_v55 }
  0x29   : > { %827 = vmatpush3.bf16.msra.mxu0 %v826_v44  ;;  %v548_v44 = vld [vmem:[%s1404_s3 + $0x28] sm:$0xff] }
  0x2a   : > { %829 = vmatprep.subr.bf16.mxu0 %v828_v45  ;;  %v550_v45 = vld [vmem:[%s1404_s3 + $0x38] sm:$0xff] }
  0x2b   : > { %846 = vmatpush1.bf16.msra.mxu1 %v845_v3 }
  0x2c   : > { %847 = vmatprep.subr.bf16.mxu1 %v992_v55 }
  0x2d   : > { %831 = vmatpush3.bf16.msra.mxu0 %v830_v48  ;;  %v872_v48 = vpack.c.bf16 %v550_v45, %v548_v44 }
  0x2e   : > { %869 = vmatprep.subr.bf16.mxu0 %v868_v42 }
  0x2f   : > { %849 = vmatpush1.bf16.msra.mxu1 %v848_v6 }
  0x30   : > { %385 = vmatmul.mubr.f32.vlgmr.msra.gmra.mrb[0].mxu0 %v1194_v49  ;;  %850 = vmatprep.subr.bf16.mxu1 %v992_v55 }
  0x31   : > { %389 = vmatprep.mubr.f32.mxu0 %v1197_v50  ;;  %871 = vmatpush1.bf16.msra.mxu0 %v870_v47 }
  0x32   : > { %873 = vmatprep.subr.bf16.mxu0 %v872_v48 }
  0x33   : > { %852 = vmatpush1.bf16.msra.mxu1 %v851_v9 }
  0x34   : > { %390 = vmatmul.mubr.f32.gmra.mrb[2].mxu0 %v1202_v51  ;;  %853 = vmatprep.subr.bf16.mxu1 %v992_v55 }
  0x35   : > { %875 = vmatpush1.bf16.msra.mxu0 %v874_v63  ;;  %641 = vmatprep.mubr.f32.mxu0 %v994_v19 }
  0x37   : > { %855 = vmatpush1.bf16.msra.mxu1 %v854_v12 }
  0x38   : > { %856 = vmatprep.subr.bf16.mxu1 %v992_v55 }
  0x3b   : > { %858 = vmatpush1.bf16.msra.mxu1 %v857_v15  ;;  %v880_v15 = vpack.c.bf16 %v558_v14, %v556_v13 }
  0x3c   : > { %859 = vmatprep.subr.bf16.mxu1 %v992_v55 }
  0x3f   : > { %861 = vmatpush1.bf16.msra.mxu1 %v860_v18  ;;  %v882_v18 = vpack.c.bf16 %v557_v17, %v555_v16 }
  0x40   : > { %862 = vmatprep.subr.bf16.mxu1 %v992_v55 }
  0x43   : > { %864 = vmatpush1.bf16.msra.mxu1 %v863_v21 }
  0x44   : > { %865 = vmatprep.subr.bf16.mxu1 %v992_v55  ;;  %v554_v55 = vld [vmem:[%s1404_s3 + $0x58] sm:$0xff] }
  0x45   : > { %v876_v0 = vpack.c.bf16 %v554_v55, %v552_v54 }
  0x47   : > { %867 = vmatpush1.bf16.msra.mxu1 %v866_v24  ;;  %877 = vmatprep.subr.bf16.mxu0 %v876_v0 }
  0x48   : > { %879 = vmatpush1.bf16.msra.mxu0 %v878_v7 }
  0x49   : > { %881 = vmatprep.subr.bf16.mxu0 %v880_v15 }
  0x4c   : > { %883 = vmatpush1.bf16.msra.mxu0 %v882_v18 }
 0x103   : > { %v794_v26 = vpop.f32.mrb[0].mxu0 }
 0x104   : > { %v795_v28 = vpop.f32.mrb[1].mxu0 }
 0x105   : > { %v796_v29 = vadd.f32 %v795_v28, %v794_v26 }
 0x107   : > { %v387_v30 = vadd.f32 %v796_v29, %v749_v27  ;;  %v797_v31 = vpop.f32.mrb[2].mxu0 }
 0x108   : > { %v798_v32 = vpop.f32.mrb[3].mxu0 }
 0x109   : > { %v395_v33 = vmax.f32 %v387_v30, 0.0  ;;  %v799_v34 = vadd.f32 %v798_v32, %v797_v31  ;;  %v561_v30 = vlaneseq }
 0x10b   : > { %v400_v35 = vrot.slane %v395_v33, 7  ;;  %v392_v36 = vadd.f32 %v799_v34, %v749_v27  ;;  %v562_v31 = vshrl.u32 %v561_v30, 7  ;;  %v559_v33 = vld [vmem:[%s1407_s6] sm:$0x3] }
 0x10d   : > { %v396_v37 = vmax.f32 %v392_v36, 0.0  ;;  %v406_v41 = vsel %vm399_vm0, 0.0, %v400_v35  ;;  %v563_v32 = vsub.s32 0, %v562_v31  ;;  %v567_v34 = vsub.s32 1, %v562_v31 }
 0x10e   : > { %v423_v58 = vrot.slane %v406_v41, 2  ;;  %v411_v59 = vrot.slane %v406_v41, 1 }
 0x10f   : > { %v401_v46 = vrot.slane %v396_v37, 7  ;;  %v568_v36 = vrot.slane %v559_v33, %v567_v34 }
 0x111   : > { %v407_v56 = vsel %vm399_vm0, %v401_v46, 0.0  ;;  %v402_v57 = vsel %vm399_vm0, %v400_v35, %v401_v46  ;;  %v564_v35 = vrot.slane %v559_v33, %v563_v32 }
 0x112   : > { %v426_v60 = vrot.slane %v407_v56, 2  ;;  %v424_v61 = vrot.slane %v402_v57, 2  ;;  %v412_v62 = vrot.slane %v402_v57, 1  ;;  %v414_v5 = vrot.slane %v407_v56, 1 }
 0x114   : > { %v425_v3 = vsel %vm422_vm1, %v423_v58, %v424_v61  ;;  %v413_v4 = vsel %vm410_vm3, %v411_v59, %v412_v62  ;;  %v427_v6 = vsel %vm422_vm1, %v424_v61, %v426_v60  ;;  %v415_v8 = vsel %vm410_vm3, %v412_v62, %v414_v5 }
 0x115   : > { %751 = vmatprep.mubr.msk.f32.mxu1 %vm428_vm2, %v425_v3  ;;  %416 = vrot.lane.b32.xlu0 %v413_v4, %s993_s19 }
 0x119   : > { %418 = vrot.lane.b32.xlu0 %v415_v8, %s993_s19  ;;  %s746_s19 = sshll.u32 %s269_s18, 5 }
 0x11a   : > { %s271_s21 = scalar_lea.vmem [#allocation2], %s746_s19 }
 0x11b   : > { %s680_s22 = sshll.u32 %s271_s21, 4  ;;  %s1353_s22 = int_to_ptr.vmem [resolvable:$true] %s680_s22 }
 0x11c   : > { %s928_s20 = scalar_lea.vmem %s1353_s22, 512  ;;  %p935_p0 = scmp.lt.s32.totalorder %s1353_s22, %s933_s13 }
 0x11d   : > { %p929_p11 = scmp.ne.s32.totalorder %s1353_s22, %s928_s20  ;;  %p936_p1 = scmp.lt.s32.totalorder %s934_s14, %s928_s20 }
 0x11f   : > { %p930_p12 = pnand %p929_p11, %p1076_p5  ;;  %p937_p2 = por %p936_p1, %p935_p0 }
 0x121   : > { %p931_p13 = pneg %p930_p12 }
 0x123   : > { %p938_p3 = pnand %p937_p2, %p931_p13 }
 0x187   : > { %v417_v9 = vpop.permute.xlu0 %416 }
 0x188   : > { %v429_v10 = vsel %vm428_vm2, %v406_v41, %v417_v9 }
 0x189   : > { %531 = vmatmul.mubr.f32.vlgmr.msra.gmra.mrb[0].mxu1 %v429_v10 }
 0x18a   : > { %752 = vmatprep.mubr.msk.f32.mxu1 %vm428_vm2, %v427_v6 }
 0x18b   : > { %v419_v11 = vpop.permute.xlu0 %418 }
 0x18c   : > { %v430_v12 = vsel %vm428_vm2, %v402_v57, %v419_v11 }
 0x18d   : > { %536 = vmatmul.mubr.f32.gmra.mrb[2].mxu1 %v430_v12 }
 0x25c   : > { %v532_v21 = vpop.f32.mrb[0].mxu1 }
 0x25d   : > { %v533_v22 = vadd.f32 %v750_v20, %v532_v21  ;;  %v534_v23 = vpop.f32.mrb[1].mxu1 }
 0x25f   : > { %v541_v24 = vmax.f32 %v533_v22, 0.0 }
 0x260   : > { %v537_v26 = vpop.f32.mrb[2].mxu1 }
 0x261   : > { %v538_v27 = vadd.f32 %v750_v20, %v537_v26  ;;  %v539_v28 = vpop.f32.mrb[3].mxu1  ;;  %753 = vmatmul.mubr.msk.f32.vlgmr.msra.gmra.mrb[4].mxu0 %vm428_vm2, %v541_v24 }
 0x262   : > { %647 = vmatprep.mubr.f32.mxu0 %v994_v19 }
 0x263   : > { %v542_v29 = vmax.f32 %v538_v27, 0.0 }
 0x265   : > { %754 = vmatmul.mubr.msk.f32.gmra.mrb[6].mxu0 %vm428_vm2, %v542_v29 }
 0x334   : > { %v643_v37 = vpop.f32.mrb[4].mxu0 }
 0x335   : > { %v644_v38 = vadd.f32 %v643_v37, %v564_v35  ;;  %v645_v39 = vpop.f32.mrb[5].mxu0 }
 0x336   : > { %v646_v40 = vadd.f32 %v645_v39, %v568_v36 }
 0x337   : > { %v654_v41 = vadd.f32 %v644_v38, %v1194_v49 }
 0x338   : > { %v655_v42 = vadd.f32 %v646_v40, %v1148_v25  ;;  %v649_v43 = vpop.f32.mrb[6].mxu0 }
 0x339   : > { %v658_v44 = vmax.f32 %v654_v41, 0.0  ;;  %v650_v45 = vadd.f32 %v649_v43, %v564_v35  ;;  %v651_v46 = vpop.f32.mrb[7].mxu0 }
 0x33a   : > { %v659_v47 = vmax.f32 %v655_v42, 0.0  ;;  %v652_v48 = vadd.f32 %v651_v46, %v568_v36 }
 0x33b   : > { %662 = vst [vmem:[%s271_s21] sm:$0xff] %v658_v44  ;;  %v656_v52 = vadd.f32 %v650_v45, %v1202_v51 }
 0x33c   : > { %663 = vst [vmem:[%s271_s21 + $0x8] sm:$0xff] %v659_v47  ;;  %v657_v53 = vadd.f32 %v652_v48, %v1197_v50 }
 0x33d   : > { %v660_v25 = vmax.f32 %v656_v52, 0.0 }
 0x33e   : > { %v661_v49 = vmax.f32 %v657_v53, 0.0 }
 0x33f   : > { %664 = vst [vmem:[%s271_s21 + $0x10] sm:$0xff] %v660_v25 }
 0x340   : > { %665 = vst [vmem:[%s271_s21 + $0x18] sm:$0xff] %v661_v49 }
 0x341   : > { %941 = shalt.err (!%p938_p3)
}
 0x342   : > { %s942_s15 = scalar_lea.hbm %s1358_s8, 512  ;;  %s946_s19 = scalar_lea.hbm %s1408_s7, 1024 }
 0x343   : > { %p943_p4 = scmp.ne.s32.totalorder %s1358_s8, %s942_s15  ;;  %p947_p9 = scmp.lt.u32.totalorder %s1358_s8, %s1408_s7 }
 0x344   : > { %p948_p10 = scmp.lt.u32.totalorder %s946_s19, %s942_s15  ;;  %p950_p12 = scmp.lt.u32.totalorder %s942_s15, %s1358_s8 }
 0x345   : > { %p944_p7 = pnand %p943_p4, %p1076_p5 }
 0x346   : > { %p949_p11 = por %p948_p10, %p947_p9 }
 0x347   : > { %p945_p8 = pneg %p944_p7 }
 0x348   : > { %p951_p13 = por %p950_p12, %p949_p11 }
 0x34a   : > { %p952_p0 = pnand %p951_p13, %p945_p8 }
 0x34c   : > { %955 = shalt.err (!%p952_p0)
}
 0x34d   : > { %s996_s23 = smov 256   ;;  %s997_s29 = smov 16  }
 0x34e   : > { %884 = dma.vmem_to_hbm [thread:$0]  (%p1076_p5), %s1353_s22, 512, %s1358_s8, %s1360_s28, %s996_s23, %s996_s23, %s997_s29  }
 0x34f PF: > { %p890_p1 = scmp.ge.s32.totalorder %s990_s27, 2  ;;  %s695_s20 = sand.u32 1, %s978_s24  }
 0x350   : > { %s696_s9 = scalar_lea.sflag [#allocation3], %s695_s20 }
 0x351   : > { %p887_p2 = pnand %p890_p1, %p1080_p6 }
 0x353   : > { %973 = dma.done.wait (!%p887_p2), %s696_s9, 512  }
 0x354   : > { %975 = vsyncadd (!%p887_p2), %s696_s9, 4294966784  ;;  %p17_p3 = scmp.ge.s32.totalorder %s1063_s30, 4   ;;  %s1411_s24 = smov %s982_s25 }
 0x355   : > { %s1412_s25 = smov %s986_s26  ;;  %s1413_s26 = smov %s1074_s10 }
 0x356   : > { %s1414_s27 = smov %s1063_s30  ;;  %19 = sbr.rel (!%p17_p3) target bundleno = 3 (0x3), region = 83 }
 0x35d   :  { %701 = vsyncpa [#allocation3], 1 }
 0x35e   :  { %703 = vsyncpa [#allocation3 + $0x1], 1 }

</bundles_post_ra>
